<compile_context>
chip_gen: v7x
topology: tpu7x:2x2x1
jax: 0.10.0
libtpu: 0.0.40
codegen_flags: <defaults>
</compile_context>

<pallas_src>
import jax
import jax.numpy as jnp
from jax.experimental import pallas as pl
from jax.experimental.pallas import tpu as pltpu


def mlp_kernel(x_ref, pack_ref, w2_ref, o_ref):
    # pack rows: 0=w1, 1=b1, 2=b2, 3=w3^T, 4=b3 (broadcast), 5..7=zero padding
    w1 = pack_ref[0:1, :]          # (1, 256)
    b1 = pack_ref[1:2, :]          # (1, 256)
    b2 = pack_ref[2:3, :]          # (1, 256)
    w3t = pack_ref[3:4, :]         # (1, 256)
    b3 = pack_ref[4:5, 0:1]        # (1, 1)

    x = x_ref[...]                 # (TB, 1) f32

    # Layer 1: K=1 contraction == broadcast multiply (VPU), bias + ReLU (f32).
    h1 = jnp.maximum(x * w1 + b1, 0.0)                       # (TB, 256)

    # Layer 2: the only real matmul (MXU). bf16 operands, f32 accumulation.
    h2 = jnp.dot(h1.astype(jnp.bfloat16), w2_ref[...],
                 preferred_element_type=jnp.float32)          # (TB, 256)
    h2 = jnp.maximum(h2 + b2, 0.0)

    # Layer 3: N=1 contraction == per-row dot (VPU multiply + XLU lane reduce).
    out = jnp.sum(h2 * w3t, axis=-1, keepdims=True) + b3      # (TB, 1)
    o_ref[...] = out.astype(o_ref.dtype)


def mlp_overfitting_forward(x, packed, *, tb=512):
    """x: (B, 1) f32. packed: {'pack': (8,256) f32, 'w2': (256,256) bf16}."""
    B = x.shape[0]
    # Batch tile: multiple of 8, capped at `tb`, padded so it divides the batch.
    tb = min(tb, max(8, ((B + 7) // 8) * 8))
    b_pad = pl.cdiv(B, tb) * tb
    if b_pad != B:
        x = jnp.pad(x, ((0, b_pad - B), (0, 0)))

    out = pl.pallas_call(
        mlp_kernel,
        out_shape=jax.ShapeDtypeStruct((b_pad, 1), jnp.float32),
        grid_spec=pltpu.PrefetchScalarGridSpec(
            num_scalar_prefetch=0,
            grid=(b_pad // tb,),
            in_specs=[
                pl.BlockSpec((tb, 1), lambda i: (i, 0)),       # x: tiled over batch
                pl.BlockSpec((8, 256), lambda i: (0, 0)),      # pack: VMEM-resident
                pl.BlockSpec((256, 256), lambda i: (0, 0)),    # w2 (bf16): VMEM-resident
            ],
            out_specs=pl.BlockSpec((tb, 1), lambda i: (i, 0)),
        ),
        compiler_params=pltpu.CompilerParams(
            dimension_semantics=("parallel",),
        ),
    )(x, packed["pack"], packed["w2"])

    return out[:B] if b_pad != B else out


def init_params(key):
    """Deterministic init mimicking PyTorch Linear default (uniform +/- 1/sqrt(fan_in))."""
    k1, k2, k3, k4, k5, k6 = jax.random.split(key, 6)

    def uni(k, shape, fan_in):
        bound = 1.0 / jnp.sqrt(float(fan_in))
        return jax.random.uniform(k, shape, jnp.float32, -bound, bound)

    return {
        "w1": uni(k1, (1, 256), 1),      # (in, out) so forward computes x @ W
        "b1": uni(k2, (1, 256), 1),
        "w2": uni(k3, (256, 256), 256),
        "b2": uni(k4, (1, 256), 256),
        "w3t": uni(k5, (1, 256), 256),   # output weight stored transposed (lane-dense)
        "b3": uni(k6, (1, 1), 256),
    }


def pack_params(p):
    """Pack small params into one tile-aligned (8,256) slab; w2 -> bf16. Done once."""
    pack = jnp.concatenate(
        [
            p["w1"], p["b1"], p["b2"], p["w3t"],
            jnp.broadcast_to(p["b3"], (1, 256)),
            jnp.zeros((3, 256), jnp.float32),
        ],
        axis=0,
    )  # (8, 256)
    return {"pack": pack, "w2": p["w2"].astype(jnp.bfloat16)}


def reference_forward(x, p):
    h1 = jnp.maximum(x @ p["w1"] + p["b1"], 0.0)
    h2 = jnp.maximum(h1 @ p["w2"] + p["b2"], 0.0)
    return h2 @ p["w3t"].T + p["b3"]


if __name__ == "__main__":
    key = jax.random.PRNGKey(0)
    pkey, xkey = jax.random.split(key)
    params = init_params(pkey)
    packed = pack_params(params)

    B = 256  # small batch; feature dim is 1 as implied by nn.Linear(1, 256)
    x = jax.random.normal(xkey, (B, 1), jnp.float32)

    out = mlp_overfitting_forward(x, packed, tb=128)  # 2 grid steps, exercises pipeline
    out = jax.block_until_ready(out)

    ref = reference_forward(x, params)  # f32 reference
    assert out.shape == (B, 1)
    # bf16 w2 path: relaxed tolerance vs the f32 reference.
    assert jnp.allclose(out, ref, atol=3e-2, rtol=3e-2), float(jnp.max(jnp.abs(out - ref)))

    print("KERNEL_OK")
</pallas_src>

<mosaic_0001>
module attributes {stable_mosaic.version = 11 : i64} {
  func.func @mlp_kernel(%arg0: i32, %arg1: memref<128x1xf32, #tpu.memory_space<vmem>>, %arg2: memref<8x256xf32, #tpu.memory_space<vmem>>, %arg3: memref<256x256xbf16, #tpu.memory_space<vmem>>, %arg4: memref<128x1xf32, #tpu.memory_space<vmem>>) attributes {dimension_semantics = [#tpu.dimension_semantics<parallel>], iteration_bounds = array<i64: 2>, scalar_prefetch = 0 : i64, scratch_operands = 0 : i64, tpu.core_type = #tpu.core_type<tc>, window_params = [{transform_indices = @transform_0, window_bounds = array<i64: 128, 1>}, {pipeline_mode = #tpu.pipeline_mode<synchronous>, transform_indices = @transform_1, window_bounds = array<i64: 8, 256>}, {pipeline_mode = #tpu.pipeline_mode<synchronous>, transform_indices = @transform_2, window_bounds = array<i64: 256, 256>}, {transform_indices = @transform_3, window_bounds = array<i64: 128, 1>}]} {
    %c0 = arith.constant 0 : index
    %c0_0 = arith.constant 0 : index
    %0 = vector.load %arg2[%c0, %c0_0] : memref<8x256xf32, #tpu.memory_space<vmem>>, vector<1x256xf32>
    %c1 = arith.constant 1 : index
    %c0_1 = arith.constant 0 : index
    %1 = vector.load %arg2[%c1, %c0_1] : memref<8x256xf32, #tpu.memory_space<vmem>>, vector<1x256xf32>
    %c2 = arith.constant 2 : index
    %c0_2 = arith.constant 0 : index
    %2 = vector.load %arg2[%c2, %c0_2] : memref<8x256xf32, #tpu.memory_space<vmem>>, vector<1x256xf32>
    %c3 = arith.constant 3 : index
    %c0_3 = arith.constant 0 : index
    %3 = vector.load %arg2[%c3, %c0_3] : memref<8x256xf32, #tpu.memory_space<vmem>>, vector<1x256xf32>
    %c4 = arith.constant 4 : index
    %c0_4 = arith.constant 0 : index
    %4 = vector.load %arg2[%c4, %c0_4] : memref<8x256xf32, #tpu.memory_space<vmem>>, vector<1x1xf32>
    %c0_5 = arith.constant 0 : index
    %c0_6 = arith.constant 0 : index
    %5 = vector.load %arg1[%c0_5, %c0_6] : memref<128x1xf32, #tpu.memory_space<vmem>>, vector<128x1xf32>
    %6 = vector.broadcast %5 : vector<128x1xf32> to vector<128x256xf32>
    %7 = vector.broadcast %0 : vector<1x256xf32> to vector<128x256xf32>
    %8 = arith.mulf %6, %7 : vector<128x256xf32>
    %9 = vector.broadcast %1 : vector<1x256xf32> to vector<128x256xf32>
    %10 = arith.addf %8, %9 : vector<128x256xf32>
    %cst = arith.constant 0.000000e+00 : f32
    %11 = vector.broadcast %cst : f32 to vector<128x256xf32>
    %12 = arith.maximumf %10, %11 : vector<128x256xf32>
    %13 = arith.truncf %12 : vector<128x256xf32> to vector<128x256xbf16>
    %c0_7 = arith.constant 0 : index
    %c0_8 = arith.constant 0 : index
    %14 = vector.load %arg3[%c0_7, %c0_8] : memref<256x256xbf16, #tpu.memory_space<vmem>>, vector<256x256xbf16>
    %cst_9 = arith.constant dense<0.000000e+00> : vector<128x256xf32>
    %15 = tpu.matmul %13, %14, %cst_9 {dimension_numbers = #tpu.dot_dimension_numbers<[1], [0], [0], [1], [0, 0, 1, 1], [], []>} : vector<128x256xbf16>, vector<256x256xbf16>, vector<128x256xf32> -> vector<128x256xf32>
    %16 = vector.broadcast %2 : vector<1x256xf32> to vector<128x256xf32>
    %17 = arith.addf %15, %16 : vector<128x256xf32>
    %cst_10 = arith.constant 0.000000e+00 : f32
    %18 = vector.broadcast %cst_10 : f32 to vector<128x256xf32>
    %19 = arith.maximumf %17, %18 : vector<128x256xf32>
    %20 = vector.broadcast %3 : vector<1x256xf32> to vector<128x256xf32>
    %21 = arith.mulf %19, %20 : vector<128x256xf32>
    %cst_11 = arith.constant dense<0.000000e+00> : vector<128xf32>
    %22 = vector.multi_reduction <add>, %21, %cst_11 [1] : vector<128x256xf32> to vector<128xf32>
    %23 = vector.shape_cast %22 : vector<128xf32> to vector<128x1xf32>
    %24 = vector.broadcast %4 : vector<1x1xf32> to vector<128x1xf32>
    %25 = arith.addf %23, %24 : vector<128x1xf32>
    %c0_12 = arith.constant 0 : index
    %c0_13 = arith.constant 0 : index
    %26 = vector.load %arg4[%c0_12, %c0_13] : memref<128x1xf32, #tpu.memory_space<vmem>>, vector<128x1xf32>
    tpu.vector_store %arg4[%c0_12, %c0_13], %25 {strides = array<i32>} : memref<128x1xf32, #tpu.memory_space<vmem>>, vector<128x1xf32>,
    return
  }
  func.func @transform_0(%arg0: i32) -> (i32, i32) {
    %c0_i32 = arith.constant 0 : i32
    %c0_i32_0 = arith.constant 0 : i32
    return %arg0, %c0_i32 : i32, i32
  }
  func.func @transform_1(%arg0: i32) -> (i32, i32) {
    %c0_i32 = arith.constant 0 : i32
    %c0_i32_0 = arith.constant 0 : i32
    %c0_i32_1 = arith.constant 0 : i32
    return %c0_i32, %c0_i32_0 : i32, i32
  }
  func.func @transform_2(%arg0: i32) -> (i32, i32) {
    %c0_i32 = arith.constant 0 : i32
    %c0_i32_0 = arith.constant 0 : i32
    %c0_i32_1 = arith.constant 0 : i32
    return %c0_i32, %c0_i32_0 : i32, i32
  }
  func.func @transform_3(%arg0: i32) -> (i32, i32) {
    %c0_i32 = arith.constant 0 : i32
    %c0_i32_0 = arith.constant 0 : i32
    return %arg0, %c0_i32 : i32, i32
  }
}

</mosaic_0001>

<bundles_post_ra>
// kernel: tpu_custom_call.1
= control target key start
LH: loop header
LB: loop body
LE: loop exit
PB: predicated region body
PF: predicated region fallthrough
CT: control target
= control target key end

     0   :  { %8 = vsyncpa [#allocation3], 0  ;;  %s1174_s12 = smov 0   ;;  %s1544_s0 = inlined_call_operand.vmem [shape: f32[256,1], index: 0, kind: input, shape index: {}]   ;;  %s1545_s1 = inlined_call_operand.hbm [shape: f32[8,256], index: 1, kind: input, shape index: {}]   ;;  %s1546_s2 = inlined_call_operand.vmem [shape: bf16[256,256], index: 2, kind: input, shape index: {}]   ;;  %s1547_s3 = inlined_call_operand.vmem [shape: f32[256,1], index: 3, kind: output, shape index: {}]  }
   0x1 LB: > { %s965_s13 = sadd.s32 4294967295, %s1150_s12   ;;  %p967_p0 = scmp.ge.s32.totalorder %s1150_s12, 1  ;;  %s1150_s12 = sphi %s1174_s12, %s14_s12  }
   0x2   : > { %p113_p1 = scmp.lt.s32.totalorder %s1150_s12, 3  ;;  %p1188_p3 = scmp.eq.s32.totalorder %s965_s13, 0 }
   0x3   : > { %s1152_s16 = smov [#allocation2]   ;;  %s1112_s21 = scalar_lea.hbm %s1545_s1, 256 }
   0x4   : > { %p1182_p2 = pnand %p967_p0, %p113_p1  ;;  %s126_s17 = sshll.u32 %s1152_s16, 4  ;;  %s127_s17 = int_to_ptr.vmem [resolvable:$true] %s126_s17 }
   0x5   : > { %s1552_s15 = scalar_select %p1188_p3, 1, 0 }
   0x6   : > { %s1551_s14 = scalar_select %p1182_p2, 1, 0 }
   0x7   : > { %p1046_p4 = pneg %p1182_p2  ;;  %p1113_p6 = scmp.ne.s32.totalorder %s1545_s1, %s1112_s21 }
   0x8   : > { %p1119_p10 = scmp.lt.u32.totalorder %s1112_s21, %s1545_s1 }
   0x9   : > { %p1196_p5 = pnand %p1188_p3, %p1046_p4 }
   0xb   : > { %p1114_p7 = pneg %p1196_p5 }
   0xd   : > { %p1115_p8 = pnand %p1114_p7, %p1113_p6 }
   0xf   : > { %p1116_p9 = pneg %p1115_p8 }
  0x11   : > { %p1121_p11 = pnand %p1119_p10, %p1116_p9 }
  0x13   : > { %1124 = shalt.err (!%p1121_p11)
}
  0x14   : > { %s1125_s26 = scalar_lea.vmem %s127_s17, 256  ;;  %p1133_p1 = scmp.lt.s32.totalorder %s127_s17, %s127_s17 }
  0x15   : > { %p1126_p12 = scmp.ne.s32.totalorder %s127_s17, %s1125_s26  ;;  %p1134_p4 = scmp.lt.s32.totalorder %s1125_s26, %s1125_s26 }
  0x17   : > { %p1128_p13 = pnand %p1126_p12, %p1114_p7  ;;  %p1135_p3 = por %p1134_p4, %p1133_p1 }
  0x19   : > { %p1129_p0 = pneg %p1128_p13 }
  0x1b   : > { %p1136_p2 = pnand %p1135_p3, %p1129_p0 }
  0x1d   : > { %1139 = shalt.err (!%p1136_p2)
}
  0x1e   : > { %1049 = dma.hbm_to_vmem [thread:$0]  (!%p1196_p5), %s1545_s1, 256, %s127_s17, [#allocation3]  }
  0x1f   : > { %p1554_p6 = scmp.ne.s32.totalorder %s1551_s14, 0 }
  0x20   : > { %p1555_p8 = scmp.ne.s32.totalorder (!%p1554_p6), %s1552_s15, 0 }
  0x21   : > { %151 = sbr.rel (%p1554_p6) target bundleno = 589 (0x24d), region = 32 }
  0x28   : > { %1145 = dma.done.wait (%p1555_p8), [#allocation3], 256  }
  0x29   : > { %1147 = vsyncadd (%p1555_p8), [#allocation3], 4294967040  ;;  %s972_s29 = sshll.u32 %s965_s13, 4  ;;  %v1153_v0 = vmov 0   ;;  %v1064_v7 = vld [vmem:[%s1546_s2 + $0x4] ss:$8 sps:$4 sm:$0xff]   ;;  %v292_v49 = vlaneseq }
  0x2a   : > { %1063 = vset.pattern.permute.xlu1 %v1153_v0  ;;  %1062 = vset.pattern.permute.xlu0 %v1153_v0  ;;  %p176_p2 = scmp.lt.s32.totalorder %s972_s29, 31  ;;  %v1066_v8 = vld [vmem:[%s1546_s2] ss:$8 sps:$4 sm:$0xff]   ;;  %v1067_v9 = vld [vmem:[%s1546_s2 + $0x14] ss:$8 sps:$4 sm:$0xff]   ;;  %vm880_vm0 = vcmask 7168  }
  0x2b   : > { %628 = vmatprep.subr.bf16.mxu0 %v1064_v7  ;;  %1010 = vmatprep.subr.bf16.mxu1 %v1064_v7  ;;  %v1069_v12 = vld [vmem:[%s1546_s2 + $0x10] ss:$8 sps:$4 sm:$0xff]   ;;  %v1070_v13 = vld [vmem:[%s1546_s2 + $0x24] ss:$8 sps:$4 sm:$0xff]   ;;  %v1072_v16 = vld [vmem:[%s1546_s2 + $0x20] ss:$8 sps:$4 sm:$0xff]  }
  0x2c   : > { %s1557_s29 = smov (!%p176_p2, %s972_s29), 31  ;;  %629 = vmatpush1.bf16.msra.mxu0 %v1066_v8  ;;  %1026 = vmatpush1.bf16.msra.mxu1 %v1066_v8  ;;  %v1073_v17 = vld [vmem:[%s1546_s2 + $0x34] ss:$8 sps:$4 sm:$0xff]   ;;  %v1075_v20 = vld [vmem:[%s1546_s2 + $0x30] ss:$8 sps:$4 sm:$0xff]   ;;  %v293_v50 = vshrl.u32 %v292_v49, 7 }
  0x2d   : > { %s973_s30 = sshll.u32 %s1557_s29, 3  ;;  %630 = vmatprep.subr.bf16.mxu0 %v1067_v9  ;;  %1011 = vmatprep.subr.bf16.mxu1 %v1067_v9  ;;  %v1076_v21 = vld [vmem:[%s1546_s2 + $0x44] ss:$8 sps:$4 sm:$0xff]   ;;  %v1078_v24 = vld [vmem:[%s1546_s2 + $0x40] ss:$8 sps:$4 sm:$0xff]  }
  0x2e   : > { %s1232_s6 = scalar_lea.vmem %s1544_s0, %s973_s30  ;;  %v1079_v25 = vld [vmem:[%s1546_s2 + $0x54] ss:$8 sps:$4 sm:$0xff]   ;;  %v1081_v28 = vld [vmem:[%s1546_s2 + $0x50] ss:$8 sps:$4 sm:$0xff]   ;;  %v1082_v29 = vld [vmem:[%s1546_s2 + $0x64] ss:$8 sps:$4 sm:$0xff]   ;;  %s1507_s26 = scalar_lea.vmem %s1547_s3, %s973_s30 }
  0x2f   : > { %v203_v1 = vld [vmem:[%s1232_s6 + $0x40] sm:$0xff]  ;;  %v204_v3 = vld [vmem:[%s1232_s6 + $0x48] sm:$0xff]  ;;  %v198_v5 = vld [vmem:[%s1232_s6 + $0x18] sm:$0xff]  ;;  %v1346_v51 = vsub.s32 0, %v293_v50  ;;  %v1348_v52 = vsub.s32 1, %v293_v50 }
  0x30   : > { %v195_v2 = vld [vmem:[%s1232_s6] sm:$0xff]  ;;  %253 = vperm.xlu1 %1063, %v203_v1   ;;  %v196_v4 = vld [vmem:[%s1232_s6 + $0x8] sm:$0xff]  ;;  %v197_v6 = vld [vmem:[%s1232_s6 + $0x10] sm:$0xff]  ;;  %631 = vmatpush1.bf16.msra.mxu0 %v1069_v12 }
  0x31   : > { %213 = vperm.xlu0 %1062, %v195_v2   ;;  %v206_v10 = vld [vmem:[%s1232_s6 + $0x58] sm:$0xff]  ;;  %v205_v11 = vld [vmem:[%s1232_s6 + $0x50] sm:$0xff]  ;;  %v200_v14 = vld [vmem:[%s1232_s6 + $0x28] sm:$0xff]  ;;  %1027 = vmatpush1.bf16.msra.mxu1 %v1069_v12 }
  0x32   : > { %v199_v15 = vld [vmem:[%s1232_s6 + $0x20] sm:$0xff]  ;;  %632 = vmatprep.subr.bf16.mxu0 %v1070_v13  ;;  %1012 = vmatprep.subr.bf16.mxu1 %v1070_v13  ;;  %v208_v18 = vld [vmem:[%s1232_s6 + $0x68] sm:$0xff]  ;;  %v202_v22 = vld [vmem:[%s1232_s6 + $0x38] sm:$0xff] }
  0x33   : > { %v207_v19 = vld [vmem:[%s1232_s6 + $0x60] sm:$0xff]  ;;  %v201_v23 = vld [vmem:[%s1232_s6 + $0x30] sm:$0xff]  ;;  %v210_v26 = vld [vmem:[%s1232_s6 + $0x78] sm:$0xff] }
  0x34   : > { %258 = vperm.xlu1 %1063, %v204_v3   ;;  %633 = vmatpush1.bf16.msra.mxu0 %v1072_v16  ;;  %v209_v27 = vld [vmem:[%s1232_s6 + $0x70] sm:$0xff]  ;;  %v1084_v30 = vld [vmem:[%s1546_s2 + $0x60] ss:$8 sps:$4 sm:$0xff]   ;;  %v1088_v33 = vld [vmem:[%s1546_s2 + $0x84] ss:$8 sps:$4 sm:$0xff]  }
  0x35   : > { %218 = vperm.xlu0 %1062, %v196_v4   ;;  %1028 = vmatpush1.bf16.msra.mxu1 %v1072_v16  ;;  %v1085_v31 = vld [vmem:[%s1546_s2 + $0x74] ss:$8 sps:$4 sm:$0xff]   ;;  %v1087_v32 = vld [vmem:[%s1546_s2 + $0x70] ss:$8 sps:$4 sm:$0xff]   ;;  %v1090_v34 = vld [vmem:[%s1546_s2 + $0x80] ss:$8 sps:$4 sm:$0xff]  }
  0x36   : > { %634 = vmatprep.subr.bf16.mxu0 %v1073_v17  ;;  %1013 = vmatprep.subr.bf16.mxu1 %v1073_v17  ;;  %v1091_v35 = vld [vmem:[%s1546_s2 + $0x94] ss:$8 sps:$4 sm:$0xff]   ;;  %v1093_v36 = vld [vmem:[%s1546_s2 + $0x90] ss:$8 sps:$4 sm:$0xff]   ;;  %v1094_v37 = vld [vmem:[%s1546_s2 + $0xa4] ss:$8 sps:$4 sm:$0xff]  }
  0x37   : > { %v1096_v38 = vld [vmem:[%s1546_s2 + $0xa0] ss:$8 sps:$4 sm:$0xff]   ;;  %v1097_v39 = vld [vmem:[%s1546_s2 + $0xb4] ss:$8 sps:$4 sm:$0xff]   ;;  %v1099_v40 = vld [vmem:[%s1546_s2 + $0xb0] ss:$8 sps:$4 sm:$0xff]  }
  0x38   : > { %228 = vperm.xlu1 %1063, %v198_v5   ;;  %635 = vmatpush1.bf16.msra.mxu0 %v1075_v20  ;;  %v1100_v41 = vld [vmem:[%s1546_s2 + $0xc4] ss:$8 sps:$4 sm:$0xff]   ;;  %v1102_v42 = vld [vmem:[%s1546_s2 + $0xc0] ss:$8 sps:$4 sm:$0xff]   ;;  %v1103_v43 = vld [vmem:[%s1546_s2 + $0xd4] ss:$8 sps:$4 sm:$0xff]  }
  0x39   : > { %223 = vperm.xlu0 %1062, %v197_v6   ;;  %1029 = vmatpush1.bf16.msra.mxu1 %v1075_v20  ;;  %v1105_v44 = vld [vmem:[%s1546_s2 + $0xd0] ss:$8 sps:$4 sm:$0xff]   ;;  %v1106_v45 = vld [vmem:[%s1546_s2 + $0xe4] ss:$8 sps:$4 sm:$0xff]   ;;  %v1108_v46 = vld [vmem:[%s1546_s2 + $0xe0] ss:$8 sps:$4 sm:$0xff]  }
  0x3a   : > { %636 = vmatprep.subr.bf16.mxu0 %v1076_v21  ;;  %1014 = vmatprep.subr.bf16.mxu1 %v1076_v21  ;;  %v1109_v47 = vld [vmem:[%s1546_s2 + $0xf4] ss:$8 sps:$4 sm:$0xff]   ;;  %v1111_v48 = vld [vmem:[%s1546_s2 + $0xf0] ss:$8 sps:$4 sm:$0xff]  }
  0x3b   : > { %v187_v53 = vld [vmem:[#allocation2] ss:$8 sm:$0x3]  ;;  %v189_v54 = vld [vmem:[#allocation2 + $0x1] ss:$8 sm:$0x3] }
  0x3c   : > { %268 = vperm.xlu1 %1063, %v206_v10   ;;  %637 = vmatpush1.bf16.msra.mxu0 %v1078_v24  ;;  %v1351_v55 = vrot.slane %v187_v53, %v1346_v51  ;;  %v1354_v56 = vrot.slane %v187_v53, %v1348_v52  ;;  %v1357_v57 = vrot.slane %v189_v54, %v1346_v51 }
  0x3d   : > { %263 = vperm.xlu0 %1062, %v205_v11   ;;  %1030 = vmatpush1.bf16.msra.mxu1 %v1078_v24  ;;  %v1360_v60 = vrot.slane %v189_v54, %v1348_v52 }
  0x3e   : > { %638 = vmatprep.subr.bf16.mxu0 %v1079_v25  ;;  %1015 = vmatprep.subr.bf16.mxu1 %v1079_v25 }
  0x40   : > { %238 = vperm.xlu1 %1063, %v200_v14   ;;  %639 = vmatpush1.bf16.msra.mxu0 %v1081_v28 }
  0x41   : > { %233 = vperm.xlu0 %1062, %v199_v15   ;;  %1031 = vmatpush1.bf16.msra.mxu1 %v1081_v28 }
  0x42   : > { %640 = vmatprep.subr.bf16.mxu0 %v1082_v29  ;;  %1016 = vmatprep.subr.bf16.mxu1 %v1082_v29 }
  0x44   : > { %278 = vperm.xlu1 %1063, %v208_v18   ;;  %641 = vmatpush1.bf16.msra.mxu0 %v1084_v30 }
  0x45   : > { %273 = vperm.xlu0 %1062, %v207_v19   ;;  %1032 = vmatpush1.bf16.msra.mxu1 %v1084_v30 }
  0x46   : > { %642 = vmatprep.subr.bf16.mxu0 %v1085_v31  ;;  %1017 = vmatprep.subr.bf16.mxu1 %v1085_v31 }
  0x48   : > { %248 = vperm.xlu1 %1063, %v202_v22   ;;  %643 = vmatpush1.bf16.msra.mxu0 %v1087_v32 }
  0x49   : > { %243 = vperm.xlu0 %1062, %v201_v23   ;;  %1033 = vmatpush1.bf16.msra.mxu1 %v1087_v32 }
  0x4a   : > { %644 = vmatprep.subr.bf16.mxu0 %v1088_v33  ;;  %1018 = vmatprep.subr.bf16.mxu1 %v1088_v33 }
  0x4c   : > { %288 = vperm.xlu1 %1063, %v210_v26   ;;  %645 = vmatpush1.bf16.msra.mxu0 %v1090_v34 }
  0x4d   : > { %283 = vperm.xlu0 %1062, %v209_v27   ;;  %1034 = vmatpush1.bf16.msra.mxu1 %v1090_v34 }
  0x4e   : > { %646 = vmatprep.subr.bf16.mxu0 %v1091_v35  ;;  %1019 = vmatprep.subr.bf16.mxu1 %v1091_v35 }
  0x50   : > { %647 = vmatpush1.bf16.msra.mxu0 %v1093_v36 }
  0x51   : > { %1035 = vmatpush1.bf16.msra.mxu1 %v1093_v36  ;;  %648 = vmatprep.subr.bf16.mxu0 %v1094_v37 }
  0x52   : > { %1020 = vmatprep.subr.bf16.mxu1 %v1094_v37 }
  0x54   : > { %649 = vmatpush1.bf16.msra.mxu0 %v1096_v38 }
  0x55   : > { %1036 = vmatpush1.bf16.msra.mxu1 %v1096_v38  ;;  %650 = vmatprep.subr.bf16.mxu0 %v1097_v39 }
  0x56   : > { %1021 = vmatprep.subr.bf16.mxu1 %v1097_v39 }
  0x58   : > { %651 = vmatpush1.bf16.msra.mxu0 %v1099_v40 }
  0x59   : > { %1037 = vmatpush1.bf16.msra.mxu1 %v1099_v40  ;;  %652 = vmatprep.subr.bf16.mxu0 %v1100_v41 }
  0x5a   : > { %1022 = vmatprep.subr.bf16.mxu1 %v1100_v41 }
  0x5c   : > { %653 = vmatpush1.bf16.msra.mxu0 %v1102_v42 }
  0x5d   : > { %1038 = vmatpush1.bf16.msra.mxu1 %v1102_v42  ;;  %654 = vmatprep.subr.bf16.mxu0 %v1103_v43 }
  0x5e   : > { %1023 = vmatprep.subr.bf16.mxu1 %v1103_v43 }
  0x60   : > { %655 = vmatpush1.bf16.msra.mxu0 %v1105_v44 }
  0x61   : > { %1039 = vmatpush1.bf16.msra.mxu1 %v1105_v44  ;;  %656 = vmatprep.subr.bf16.mxu0 %v1106_v45 }
  0x62   : > { %1024 = vmatprep.subr.bf16.mxu1 %v1106_v45 }
  0x64   : > { %657 = vmatpush1.bf16.msra.mxu0 %v1108_v46 }
  0x65   : > { %1040 = vmatpush1.bf16.msra.mxu1 %v1108_v46  ;;  %658 = vmatprep.subr.bf16.mxu0 %v1109_v47 }
  0x66   : > { %1025 = vmatprep.subr.bf16.mxu1 %v1109_v47 }
  0x68   : > { %659 = vmatpush1.bf16.msra.mxu0 %v1111_v48 }
  0x69   : > { %1041 = vmatpush1.bf16.msra.mxu1 %v1111_v48 }
  0xaf   : > { %v254_v58 = vpop.permute.xlu1 %253 }
  0xb0   : > { %v214_v59 = vpop.permute.xlu0 %213  ;;  %v318_v61 = vmul.f32 %v1351_v55, %v254_v58  ;;  %v319_v62 = vmul.f32 %v1354_v56, %v254_v58 }
  0xb1   : > { %v302_v63 = vmul.f32 %v1351_v55, %v214_v59  ;;  %v303_v0 = vmul.f32 %v1354_v56, %v214_v59 }
  0xb2   : > { %v361_v1 = vadd.f32 %v1357_v57, %v318_v61  ;;  %v362_v6 = vadd.f32 %v1360_v60, %v319_v62 }
  0xb3   : > { %v345_v2 = vadd.f32 %v1357_v57, %v302_v63  ;;  %v259_v3 = vpop.permute.xlu1 %258  ;;  %v346_v5 = vadd.f32 %v1360_v60, %v303_v0 }
  0xb4   : > { %v219_v4 = vpop.permute.xlu0 %218  ;;  %v320_v7 = vmul.f32 %v1351_v55, %v259_v3  ;;  %v321_v8 = vmul.f32 %v1354_v56, %v259_v3  ;;  %v393_v11 = vmax.f32 %v361_v1, 0.0  ;;  %v394_v20 = vmax.f32 %v362_v6, 0.0 }
  0xb5   : > { %v304_v9 = vmul.f32 %v1351_v55, %v219_v4  ;;  %v305_v10 = vmul.f32 %v1354_v56, %v219_v4  ;;  %v377_v12 = vmax.f32 %v345_v2, 0.0  ;;  %v378_v19 = vmax.f32 %v346_v5, 0.0 }
  0xb6   : > { %v363_v13 = vadd.f32 %v1357_v57, %v320_v7  ;;  %v364_v14 = vadd.f32 %v1360_v60, %v321_v8 }
  0xb7   : > { %v347_v15 = vadd.f32 %v1357_v57, %v304_v9  ;;  %v229_v16 = vpop.permute.xlu1 %228  ;;  %v348_v18 = vadd.f32 %v1360_v60, %v305_v10 }
  0xb8   : > { %v224_v17 = vpop.permute.xlu0 %223  ;;  %v395_v21 = vmax.f32 %v363_v13, 0.0  ;;  %v308_v22 = vmul.f32 %v1351_v55, %v229_v16  ;;  %v309_v23 = vmul.f32 %v1354_v56, %v229_v16  ;;  %v396_v28 = vmax.f32 %v364_v14, 0.0 }
  0xb9   : > { %v306_v24 = vmul.f32 %v1351_v55, %v224_v17  ;;  %v379_v25 = vmax.f32 %v347_v15, 0.0  ;;  %v307_v26 = vmul.f32 %v1354_v56, %v224_v17  ;;  %v380_v27 = vmax.f32 %v348_v18, 0.0 }
  0xba   : > { %v351_v29 = vadd.f32 %v1357_v57, %v308_v22  ;;  %v352_v30 = vadd.f32 %v1360_v60, %v309_v23  ;;  %v417_v32 = vpack.c.bf16 %v395_v21, %v393_v11  ;;  %v418_v37 = vpack.c.bf16 %v396_v28, %v394_v20 }
  0xbb   : > { %v349_v31 = vadd.f32 %v1357_v57, %v306_v24  ;;  %v350_v33 = vadd.f32 %v1360_v60, %v307_v26  ;;  %v269_v34 = vpop.permute.xlu1 %268  ;;  %v410_v36 = vpack.c.bf16 %v380_v27, %v378_v19  ;;  %v409_v38 = vpack.c.bf16 %v379_v25, %v377_v12 }
  0xbc   : > { %v264_v35 = vpop.permute.xlu0 %263  ;;  %v384_v39 = vmax.f32 %v352_v30, 0.0  ;;  %v324_v40 = vmul.f32 %v1351_v55, %v269_v34  ;;  %v325_v42 = vmul.f32 %v1354_v56, %v269_v34  ;;  %700 = vmatprep.mubr.bf16.mxu1 %v418_v37  ;;  %v383_v45 = vmax.f32 %v351_v29, 0.0 }
  0xbd   : > { %v382_v41 = vmax.f32 %v350_v33, 0.0  ;;  %v322_v43 = vmul.f32 %v1351_v55, %v264_v35  ;;  %v323_v44 = vmul.f32 %v1354_v56, %v264_v35  ;;  %660 = vmatprep.mubr.bf16.mxu0 %v410_v36  ;;  %v381_v46 = vmax.f32 %v349_v31, 0.0  ;;  %701 = vmatmul.mubr.bf16.vlgmr.msra.gmra.mrb[0].mxu1 %v417_v32 }
  0xbe   : > { %v367_v47 = vadd.f32 %v1357_v57, %v324_v40  ;;  %661 = vmatmul.mubr.bf16.vlgmr.msra.gmra.mrb[0].mxu0 %v409_v38  ;;  %v368_v48 = vadd.f32 %v1360_v60, %v325_v42 }
  0xbf   : > { %v365_v49 = vadd.f32 %v1357_v57, %v322_v43  ;;  %v366_v50 = vadd.f32 %v1360_v60, %v323_v44  ;;  %v239_v53 = vpop.permute.xlu1 %238  ;;  %v412_v58 = vpack.c.bf16 %v384_v39, %v382_v41  ;;  %v411_v14 = vpack.c.bf16 %v383_v45, %v381_v46 }
  0xc0   : > { %v234_v54 = vpop.permute.xlu0 %233  ;;  %v399_v59 = vmax.f32 %v367_v47, 0.0  ;;  %v312_v61 = vmul.f32 %v1351_v55, %v239_v53  ;;  %v313_v62 = vmul.f32 %v1354_v56, %v239_v53  ;;  %v400_v0 = vmax.f32 %v368_v48, 0.0 }
  0xc1   : > { %v310_v63 = vmul.f32 %v1351_v55, %v234_v54  ;;  %v397_v1 = vmax.f32 %v365_v49, 0.0  ;;  %v398_v2 = vmax.f32 %v366_v50, 0.0  ;;  %v311_v3 = vmul.f32 %v1354_v56, %v234_v54  ;;  %670 = vmatprep.mubr.bf16.mxu0 %v412_v58 }
  0xc2   : > { %v355_v4 = vadd.f32 %v1357_v57, %v312_v61  ;;  %v356_v5 = vadd.f32 %v1360_v60, %v313_v62 }
  0xc3   : > { %v353_v6 = vadd.f32 %v1357_v57, %v310_v63  ;;  %v354_v7 = vadd.f32 %v1360_v60, %v311_v3  ;;  %v279_v8 = vpop.permute.xlu1 %278  ;;  %v420_v10 = vpack.c.bf16 %v400_v0, %v398_v2  ;;  %v419_v11 = vpack.c.bf16 %v399_v59, %v397_v1 }
  0xc4   : > { %v274_v9 = vpop.permute.xlu0 %273  ;;  %v388_v12 = vmax.f32 %v356_v5, 0.0  ;;  %v328_v13 = vmul.f32 %v1351_v55, %v279_v8  ;;  %v329_v16 = vmul.f32 %v1354_v56, %v279_v8  ;;  %v387_v19 = vmax.f32 %v355_v4, 0.0  ;;  %v191_v5 = vld [vmem:[#allocation2 + $0x2] ss:$8 sm:$0x3] }
  0xc5   : > { %v386_v15 = vmax.f32 %v354_v7, 0.0  ;;  %v326_v17 = vmul.f32 %v1351_v55, %v274_v9  ;;  %v327_v18 = vmul.f32 %v1354_v56, %v274_v9  ;;  %710 = vmatprep.mubr.bf16.mxu1 %v420_v10  ;;  %v385_v20 = vmax.f32 %v353_v6, 0.0 }
  0xc6   : > { %v371_v21 = vadd.f32 %v1357_v57, %v328_v13  ;;  %671 = vmatmul.mubr.bf16.gmra.mrb[4].mxu0 %v411_v14  ;;  %711 = vmatmul.mubr.bf16.gmra.mrb[4].mxu1 %v419_v11  ;;  %v372_v22 = vadd.f32 %v1360_v60, %v329_v16  ;;  %v1427_v6 = vrot.slane %v191_v5, %v1346_v51 }
  0xc7   : > { %v369_v23 = vadd.f32 %v1357_v57, %v326_v17  ;;  %v370_v24 = vadd.f32 %v1360_v60, %v327_v18  ;;  %v249_v25 = vpop.permute.xlu1 %248  ;;  %v414_v27 = vpack.c.bf16 %v388_v12, %v386_v15  ;;  %v413_v41 = vpack.c.bf16 %v387_v19, %v385_v20 }
  0xc8   : > { %v244_v26 = vpop.permute.xlu0 %243  ;;  %v403_v28 = vmax.f32 %v371_v21, 0.0  ;;  %v316_v29 = vmul.f32 %v1351_v55, %v249_v25  ;;  %v317_v30 = vmul.f32 %v1354_v56, %v249_v25  ;;  %v404_v32 = vmax.f32 %v372_v22, 0.0 }
  0xc9   : > { %v314_v31 = vmul.f32 %v1351_v55, %v244_v26  ;;  %v401_v33 = vmax.f32 %v369_v23, 0.0  ;;  %v402_v34 = vmax.f32 %v370_v24, 0.0  ;;  %v315_v35 = vmul.f32 %v1354_v56, %v244_v26  ;;  %680 = vmatprep.mubr.bf16.mxu0 %v414_v27 }
  0xca   : > { %v360_v36 = vadd.f32 %v1360_v60, %v317_v30  ;;  %v359_v43 = vadd.f32 %v1357_v57, %v316_v29 }
  0xcb   : > { %v358_v37 = vadd.f32 %v1360_v60, %v315_v35  ;;  %v289_v38 = vpop.permute.xlu1 %288  ;;  %v422_v40 = vpack.c.bf16 %v404_v32, %v402_v34  ;;  %v421_v42 = vpack.c.bf16 %v403_v28, %v401_v33  ;;  %v357_v45 = vadd.f32 %v1357_v57, %v314_v31 }
  0xcc   : > { %v284_v39 = vpop.permute.xlu0 %283  ;;  %v392_v44 = vmax.f32 %v360_v36, 0.0  ;;  %v332_v46 = vmul.f32 %v1351_v55, %v289_v38  ;;  %v333_v48 = vmul.f32 %v1354_v56, %v289_v38  ;;  %v391_v62 = vmax.f32 %v359_v43, 0.0 }
  0xcd   : > { %v390_v47 = vmax.f32 %v358_v37, 0.0  ;;  %v330_v49 = vmul.f32 %v1351_v55, %v284_v39  ;;  %v331_v50 = vmul.f32 %v1354_v56, %v284_v39  ;;  %720 = vmatprep.mubr.bf16.mxu1 %v422_v40  ;;  %v389_v63 = vmax.f32 %v357_v45, 0.0 }
  0xce   : > { %v375_v53 = vadd.f32 %v1357_v57, %v332_v46  ;;  %681 = vmatmul.mubr.bf16.gmra.mrb[8].mxu0 %v413_v41  ;;  %721 = vmatmul.mubr.bf16.gmra.mrb[8].mxu1 %v421_v42  ;;  %v376_v54 = vadd.f32 %v1360_v60, %v333_v48 }
  0xcf   : > { %v373_v58 = vadd.f32 %v1357_v57, %v330_v49  ;;  %v374_v59 = vadd.f32 %v1360_v60, %v331_v50  ;;  %v416_v61 = vpack.c.bf16 %v392_v44, %v390_v47  ;;  %v415_v4 = vpack.c.bf16 %v391_v62, %v389_v63  ;;  %v193_v57 = vld [vmem:[#allocation2 + $0x3] ss:$8 sm:$0x3] }
  0xd0   : > { %v407_v0 = vmax.f32 %v375_v53, 0.0  ;;  %v408_v1 = vmax.f32 %v376_v54, 0.0  ;;  %v1430_v60 = vrot.slane %v191_v5, %v1348_v52  ;;  %v1434_v10 = vrot.slane %v193_v57, %v1346_v51 }
  0xd1   : > { %v405_v2 = vmax.f32 %v373_v58, 0.0  ;;  %v406_v55 = vmax.f32 %v374_v59, 0.0  ;;  %690 = vmatprep.mubr.bf16.mxu0 %v416_v61  ;;  %v1439_v15 = vrot.slane %v193_v57, %v1348_v52 }
  0xd3   : > { %v424_v56 = vpack.c.bf16 %v408_v1, %v406_v55  ;;  %v423_v3 = vpack.c.bf16 %v407_v0, %v405_v2 }
  0xd5   : > { %730 = vmatprep.mubr.bf16.mxu1 %v424_v56 }
  0xd6   : > { %691 = vmatmul.mubr.bf16.gmra.mrb[12].mxu0 %v415_v4  ;;  %731 = vmatmul.mubr.bf16.gmra.mrb[12].mxu1 %v423_v3 }
 0x190   : > { %v702_v8 = vpop.f32.mrb[0].mxu1 }
 0x191   : > { %v662_v7 = vpop.f32.mrb[0].mxu0  ;;  %v703_v11 = vadd.f32 %v702_v8, %v1427_v6  ;;  %v704_v13 = vpop.f32.mrb[1].mxu1 }
 0x192   : > { %v663_v9 = vadd.f32 %v662_v7, %v1427_v6  ;;  %v664_v12 = vpop.f32.mrb[1].mxu0  ;;  %v705_v16 = vadd.f32 %v704_v13, %v1430_v60  ;;  %v706_v18 = vpop.f32.mrb[2].mxu1 }
 0x193   : > { %v665_v14 = vadd.f32 %v664_v12, %v1430_v60  ;;  %v666_v17 = vpop.f32.mrb[2].mxu0  ;;  %v757_v20 = vmax.f32 %v703_v11, 0.0  ;;  %v707_v51 = vadd.f32 %v706_v18, %v1427_v6  ;;  %v708_v23 = vpop.f32.mrb[3].mxu1 }
 0x194   : > { %v741_v19 = vmax.f32 %v663_v9, 0.0  ;;  %v667_v21 = vadd.f32 %v666_v17, %v1427_v6  ;;  %v668_v22 = vpop.f32.mrb[3].mxu0  ;;  %v758_v25 = vmax.f32 %v705_v16, 0.0  ;;  %v709_v27 = vadd.f32 %v708_v23, %v1430_v60 }
 0x195   : > { %v742_v24 = vmax.f32 %v665_v14, 0.0  ;;  %v669_v26 = vadd.f32 %v668_v22, %v1430_v60  ;;  %v800_v28 = vmul.f32 %v1434_v10, %v757_v20  ;;  %v759_v30 = vmax.f32 %v707_v51, 0.0 }
 0x196   : > { %v784_v52 = vmul.f32 %v1434_v10, %v741_v19  ;;  %v743_v29 = vmax.f32 %v667_v21, 0.0  ;;  %v801_v32 = vmul.f32 %v1439_v15, %v758_v25  ;;  %v760_v34 = vmax.f32 %v709_v27, 0.0 }
 0x197   : > { %v785_v31 = vmul.f32 %v1439_v15, %v742_v24  ;;  %v744_v33 = vmax.f32 %v669_v26, 0.0  ;;  %v802_v41 = vmul.f32 %v1434_v10, %v759_v30 }
 0x198   : > { %v786_v35 = vmul.f32 %v1434_v10, %v743_v29  ;;  %v840_v39 = vadd.f32 %v801_v32, %v800_v28  ;;  %v803_v42 = vmul.f32 %v1439_v15, %v760_v34 }
 0x199   : > { %v787_v36 = vmul.f32 %v1439_v15, %v744_v33  ;;  %v672_v37 = vpop.f32.mrb[4].mxu0  ;;  %v712_v38 = vpop.f32.mrb[4].mxu1  ;;  %v816_v40 = vadd.f32 %v785_v31, %v784_v52 }
 0x19a   : > { %v673_v43 = vadd.f32 %v672_v37, %v1427_v6  ;;  %v713_v44 = vadd.f32 %v712_v38, %v1427_v6  ;;  %v674_v45 = vpop.f32.mrb[5].mxu0  ;;  %v714_v46 = vpop.f32.mrb[5].mxu1  ;;  %841 = vadd.xlane.f32.xlu1 %v840_v39  ;;  %v843_v13 = vadd.f32 %v803_v42, %v802_v41 }
 0x19b   : > { %v675_v47 = vadd.f32 %v674_v45, %v1430_v60  ;;  %v715_v48 = vadd.f32 %v714_v46, %v1430_v60  ;;  %v716_v49 = vpop.f32.mrb[6].mxu1  ;;  %v676_v50 = vpop.f32.mrb[6].mxu0  ;;  %817 = vadd.xlane.f32.xlu0 %v816_v40  ;;  %v819_v53 = vadd.f32 %v787_v36, %v786_v35 }
 0x19c   : > { %v745_v54 = vmax.f32 %v673_v43, 0.0  ;;  %v761_v58 = vmax.f32 %v713_v44, 0.0  ;;  %v717_v59 = vadd.f32 %v716_v49, %v1427_v6  ;;  %v677_v61 = vadd.f32 %v676_v50, %v1427_v6  ;;  %v678_v62 = vpop.f32.mrb[7].mxu0  ;;  %v718_v63 = vpop.f32.mrb[7].mxu1 }
 0x19d   : > { %v746_v0 = vmax.f32 %v675_v47, 0.0  ;;  %v762_v1 = vmax.f32 %v715_v48, 0.0  ;;  %v679_v2 = vadd.f32 %v678_v62, %v1430_v60  ;;  %v719_v55 = vadd.f32 %v718_v63, %v1430_v60 }
 0x19e   : > { %v788_v56 = vmul.f32 %v1434_v10, %v745_v54  ;;  %v804_v3 = vmul.f32 %v1434_v10, %v761_v58  ;;  %v763_v4 = vmax.f32 %v717_v59, 0.0  ;;  %v747_v5 = vmax.f32 %v677_v61, 0.0  ;;  %820 = vadd.xlane.f32.xlu1 %v819_v53 }
 0x19f   : > { %v789_v57 = vmul.f32 %v1439_v15, %v746_v0  ;;  %v805_v7 = vmul.f32 %v1439_v15, %v762_v1  ;;  %v748_v8 = vmax.f32 %v679_v2, 0.0  ;;  %v764_v9 = vmax.f32 %v719_v55, 0.0  ;;  %844 = vadd.xlane.f32.xlu0 %v843_v13 }
 0x1a0   : > { %v806_v11 = vmul.f32 %v1434_v10, %v763_v4  ;;  %v790_v12 = vmul.f32 %v1434_v10, %v747_v5 }
 0x1a1   : > { %v791_v14 = vmul.f32 %v1439_v15, %v748_v8  ;;  %v807_v16 = vmul.f32 %v1439_v15, %v764_v9  ;;  %v682_v17 = vpop.f32.mrb[8].mxu0  ;;  %v722_v18 = vpop.f32.mrb[8].mxu1  ;;  %v846_v19 = vadd.f32 %v805_v7, %v804_v3  ;;  %v822_v20 = vadd.f32 %v789_v57, %v788_v56 }
 0x1a2   : > { %v683_v21 = vadd.f32 %v682_v17, %v1427_v6  ;;  %v723_v51 = vadd.f32 %v722_v18, %v1427_v6  ;;  %v684_v22 = vpop.f32.mrb[9].mxu0  ;;  %v724_v23 = vpop.f32.mrb[9].mxu1 }
 0x1a3   : > { %v685_v24 = vadd.f32 %v684_v22, %v1430_v60  ;;  %v725_v25 = vadd.f32 %v724_v23, %v1430_v60  ;;  %v686_v26 = vpop.f32.mrb[10].mxu0  ;;  %v726_v27 = vpop.f32.mrb[10].mxu1  ;;  %847 = vadd.xlane.f32.xlu1 %v846_v19  ;;  %v825_v52 = vadd.f32 %v791_v14, %v790_v12  ;;  %v849_v28 = vadd.f32 %v807_v16, %v806_v11 }
 0x1a4   : > { %v749_v29 = vmax.f32 %v683_v21, 0.0  ;;  %v765_v30 = vmax.f32 %v723_v51, 0.0  ;;  %v687_v31 = vadd.f32 %v686_v26, %v1427_v6  ;;  %v727_v32 = vadd.f32 %v726_v27, %v1427_v6  ;;  %v688_v33 = vpop.f32.mrb[11].mxu0  ;;  %v728_v34 = vpop.f32.mrb[11].mxu1  ;;  %823 = vadd.xlane.f32.xlu0 %v822_v20 }
 0x1a5   : > { %v750_v35 = vmax.f32 %v685_v24, 0.0  ;;  %v766_v36 = vmax.f32 %v725_v25, 0.0  ;;  %v689_v37 = vadd.f32 %v688_v33, %v1430_v60  ;;  %v729_v38 = vadd.f32 %v728_v34, %v1430_v60 }
 0x1a6   : > { %v792_v39 = vmul.f32 %v1434_v10, %v749_v29  ;;  %v808_v40 = vmul.f32 %v1434_v10, %v765_v30  ;;  %v751_v41 = vmax.f32 %v687_v31, 0.0  ;;  %v767_v42 = vmax.f32 %v727_v32, 0.0  ;;  %v194_v29 = vld [vmem:[#allocation2 + $0x4] ss:$0 sm:$0xff] }
 0x1a7   : > { %v793_v43 = vmul.f32 %v1439_v15, %v750_v35  ;;  %v809_v44 = vmul.f32 %v1439_v15, %v766_v36  ;;  %v752_v45 = vmax.f32 %v689_v37, 0.0  ;;  %v768_v46 = vmax.f32 %v729_v38, 0.0 }
 0x1a8   : > { %v794_v47 = vmul.f32 %v1434_v10, %v751_v41  ;;  %v810_v48 = vmul.f32 %v1434_v10, %v767_v42  ;;  %826 = vadd.xlane.f32.xlu0 %v825_v52 }
 0x1a9   : > { %v795_v49 = vmul.f32 %v1439_v15, %v752_v45  ;;  %v811_v50 = vmul.f32 %v1439_v15, %v768_v46  ;;  %v692_v53 = vpop.f32.mrb[12].mxu0  ;;  %v732_v54 = vpop.f32.mrb[12].mxu1  ;;  %v828_v58 = vadd.f32 %v793_v43, %v792_v39  ;;  %v852_v59 = vadd.f32 %v809_v44, %v808_v40 }
 0x1aa   : > { %v693_v61 = vadd.f32 %v692_v53, %v1427_v6  ;;  %v733_v62 = vadd.f32 %v732_v54, %v1427_v6  ;;  %v694_v63 = vpop.f32.mrb[13].mxu0  ;;  %v734_v0 = vpop.f32.mrb[13].mxu1 }
 0x1ab   : > { %v695_v1 = vadd.f32 %v694_v63, %v1430_v60  ;;  %v735_v2 = vadd.f32 %v734_v0, %v1430_v60  ;;  %v696_v55 = vpop.f32.mrb[14].mxu0  ;;  %v736_v56 = vpop.f32.mrb[14].mxu1  ;;  %829 = vadd.xlane.f32.xlu1 %v828_v58  ;;  %v831_v3 = vadd.f32 %v795_v49, %v794_v47  ;;  %v855_v4 = vadd.f32 %v811_v50, %v810_v48 }
 0x1ac   : > { %v753_v5 = vmax.f32 %v693_v61, 0.0  ;;  %v769_v57 = vmax.f32 %v733_v62, 0.0  ;;  %v697_v7 = vadd.f32 %v696_v55, %v1427_v6  ;;  %v737_v8 = vadd.f32 %v736_v56, %v1427_v6  ;;  %v698_v9 = vpop.f32.mrb[15].mxu0  ;;  %v738_v11 = vpop.f32.mrb[15].mxu1  ;;  %850 = vadd.xlane.f32.xlu0 %v849_v28 }
 0x1ad   : > { %v754_v12 = vmax.f32 %v695_v1, 0.0  ;;  %v770_v13 = vmax.f32 %v735_v2, 0.0  ;;  %v699_v14 = vadd.f32 %v698_v9, %v1430_v60  ;;  %v739_v16 = vadd.f32 %v738_v11, %v1430_v60 }
 0x1ae   : > { %v796_v17 = vmul.f32 %v1434_v10, %v753_v5  ;;  %v812_v18 = vmul.f32 %v1434_v10, %v769_v57  ;;  %v755_v19 = vmax.f32 %v697_v7, 0.0  ;;  %v771_v20 = vmax.f32 %v737_v8, 0.0 }
 0x1af   : > { %v797_v21 = vmul.f32 %v1439_v15, %v754_v12  ;;  %v813_v51 = vmul.f32 %v1439_v15, %v770_v13  ;;  %v756_v6 = vmax.f32 %v699_v14, 0.0  ;;  %v772_v22 = vmax.f32 %v739_v16, 0.0  ;;  %853 = vadd.xlane.f32.xlu1 %v852_v59 }
 0x1b0   : > { %v798_v23 = vmul.f32 %v1434_v10, %v755_v19  ;;  %v814_v24 = vmul.f32 %v1434_v10, %v771_v20  ;;  %832 = vadd.xlane.f32.xlu0 %v831_v3 }
 0x1b1   : > { %v799_v60 = vmul.f32 %v1439_v15, %v756_v6  ;;  %v815_v25 = vmul.f32 %v1439_v15, %v772_v22  ;;  %v834_v26 = vadd.f32 %v797_v21, %v796_v17  ;;  %v858_v27 = vadd.f32 %v813_v51, %v812_v18 }
 0x1b3   : > { %835 = vadd.xlane.f32.xlu1 %v834_v26  ;;  %v837_v52 = vadd.f32 %v799_v60, %v798_v23  ;;  %v861_v28 = vadd.f32 %v815_v25, %v814_v24 }
 0x1b4   : > { %856 = vadd.xlane.f32.xlu0 %v855_v4 }
 0x1b7   : > { %859 = vadd.xlane.f32.xlu1 %v858_v27 }
 0x1b8   : > { %838 = vadd.xlane.f32.xlu0 %v837_v52 }
 0x1bc   : > { %862 = vadd.xlane.f32.xlu0 %v861_v28 }
 0x227   : > { %v842_v10 = vpop.xlane.xlu1 %841 }
 0x228   : > { %v818_v15 = vpop.xlane.xlu0 %817  ;;  %v872_v30 = vadd.f32 %v842_v10, %v194_v29 }
 0x229   : > { %v864_v31 = vadd.f32 %v818_v15, %v194_v29 }
 0x22a   : > { %889 = vst.msk [vmem:[%s1507_s26 + $0x40] sm:$0xff] %vm880_vm0, %v872_v30 }
 0x22b   : > { %881 = vst.msk [vmem:[%s1507_s26] sm:$0xff] %vm880_vm0, %v864_v31  ;;  %v821_v32 = vpop.xlane.xlu1 %820 }
 0x22c   : > { %v865_v33 = vadd.f32 %v821_v32, %v194_v29  ;;  %v845_v34 = vpop.xlane.xlu0 %844 }
 0x22d   : > { %v873_v35 = vadd.f32 %v845_v34, %v194_v29 }
 0x22e   : > { %882 = vst.msk [vmem:[%s1507_s26 + $0x8] sm:$0xff] %vm880_vm0, %v865_v33 }
 0x22f   : > { %890 = vst.msk [vmem:[%s1507_s26 + $0x48] sm:$0xff] %vm880_vm0, %v873_v35 }
 0x230   : > { %v848_v36 = vpop.xlane.xlu1 %847 }
 0x231   : > { %v874_v37 = vadd.f32 %v848_v36, %v194_v29  ;;  %v824_v38 = vpop.xlane.xlu0 %823 }
 0x232   : > { %v866_v39 = vadd.f32 %v824_v38, %v194_v29 }
 0x233   : > { %891 = vst.msk [vmem:[%s1507_s26 + $0x50] sm:$0xff] %vm880_vm0, %v874_v37 }
 0x234   : > { %883 = vst.msk [vmem:[%s1507_s26 + $0x10] sm:$0xff] %vm880_vm0, %v866_v39 }
 0x235   : > { %v827_v40 = vpop.xlane.xlu0 %826 }
 0x236   : > { %v867_v41 = vadd.f32 %v827_v40, %v194_v29 }
 0x238   : > { %v830_v42 = vpop.xlane.xlu1 %829  ;;  %884 = vst.msk [vmem:[%s1507_s26 + $0x18] sm:$0xff] %vm880_vm0, %v867_v41 }
 0x239   : > { %v868_v43 = vadd.f32 %v830_v42, %v194_v29  ;;  %v851_v44 = vpop.xlane.xlu0 %850 }
 0x23a   : > { %v875_v45 = vadd.f32 %v851_v44, %v194_v29 }
 0x23b   : > { %885 = vst.msk [vmem:[%s1507_s26 + $0x20] sm:$0xff] %vm880_vm0, %v868_v43 }
 0x23c   : > { %v854_v46 = vpop.xlane.xlu1 %853  ;;  %892 = vst.msk [vmem:[%s1507_s26 + $0x58] sm:$0xff] %vm880_vm0, %v875_v45 }
 0x23d   : > { %v876_v47 = vadd.f32 %v854_v46, %v194_v29  ;;  %v833_v48 = vpop.xlane.xlu0 %832 }
 0x23e   : > { %v869_v49 = vadd.f32 %v833_v48, %v194_v29 }
 0x23f   : > { %893 = vst.msk [vmem:[%s1507_s26 + $0x60] sm:$0xff] %vm880_vm0, %v876_v47 }
 0x240   : > { %v836_v50 = vpop.xlane.xlu1 %835  ;;  %886 = vst.msk [vmem:[%s1507_s26 + $0x28] sm:$0xff] %vm880_vm0, %v869_v49 }
 0x241   : > { %v870_v53 = vadd.f32 %v836_v50, %v194_v29  ;;  %v857_v54 = vpop.xlane.xlu0 %856 }
 0x242   : > { %v877_v58 = vadd.f32 %v857_v54, %v194_v29 }
 0x243   : > { %887 = vst.msk [vmem:[%s1507_s26 + $0x30] sm:$0xff] %vm880_vm0, %v870_v53 }
 0x244   : > { %v860_v59 = vpop.xlane.xlu1 %859  ;;  %894 = vst.msk [vmem:[%s1507_s26 + $0x68] sm:$0xff] %vm880_vm0, %v877_v58 }
 0x245   : > { %v878_v61 = vadd.f32 %v860_v59, %v194_v29  ;;  %v839_v62 = vpop.xlane.xlu0 %838 }
 0x246   : > { %v871_v63 = vadd.f32 %v839_v62, %v194_v29 }
 0x247   : > { %895 = vst.msk [vmem:[%s1507_s26 + $0x70] sm:$0xff] %vm880_vm0, %v878_v61 }
 0x248   : > { %888 = vst.msk [vmem:[%s1507_s26 + $0x38] sm:$0xff] %vm880_vm0, %v871_v63 }
 0x249   : > { %v863_v0 = vpop.xlane.xlu0 %862 }
 0x24a   : > { %v879_v1 = vadd.f32 %v863_v0, %v194_v29 }
 0x24c   : > { %896 = vst.msk [vmem:[%s1507_s26 + $0x78] sm:$0xff] %vm880_vm0, %v879_v1 }
 0x24d PF: > { %s14_s12 = sadd.s32 1, %s1150_s12  }
 0x24e   : > { %p11_p3 = scmp.ge.s32.totalorder %s14_s12, 4  }
 0x250   :  { %13 = sbr.rel (!%p11_p3) target bundleno = 1 (0x1), region = 70 }
 0x257   :  { %919 = vsyncpa [#allocation3], 1 }
 0x258   :  { %921 = vsyncpa [#allocation3 + $0x1], 1 }

</bundles_post_ra>
